<compile_context>
chip_gen: v6e
topology: v6e:2x2x1
jax: 0.10.0
libtpu: 0.0.40
codegen_flags: <defaults>
</compile_context>

<pallas_src>
import functools

import jax
import jax.numpy as jnp
from jax.experimental import pallas as pl
from jax.experimental.pallas import tpu as pltpu


def _round_up(n, m):
    return ((n + m - 1) // m) * m


def _round_down(n, m):
    return (n // m) * m


def _sublane_multiple(dtype):
    # f32 -> 8, bf16 -> 16, int8/fp8 -> 32 (packed sublane tiles)
    return max(8, 32 // jnp.dtype(dtype).itemsize)


_VMEM_LIMIT = 48 << 20    # explicit scoped-VMEM request; fits v5e/v6e (128 MiB) and v7x (64 MiB)
_FUSE_BUDGET = 24 << 20   # modeled live bytes allowed for the fused single-pass path
_TILE_TARGET = 2 << 20    # ~2 MiB x-blocks for the two-pass fallback


# ---------------- Fused single-pass kernel: reduce + sigmoid + scale ----------------
def _fused_kernel(bias_ref, w_ref, x_ref, o_ref):
    # bias_ref: SMEM (1,)      conv1 bias
    # w_ref:    VMEM (1, N)    w_rep = repeat(conv_w, HW)/HW (constant block -> fetched once)
    # x_ref:    VMEM (Bt, N)   full lane-dim row block of x
    # o_ref:    VMEM (Bt, N)
    xf = x_ref[...].astype(jnp.float32)
    s = jnp.sum(xf * w_ref[...], axis=-1, keepdims=True)          # (Bt, 1) pre-bias logit
    scale = jax.nn.sigmoid(s + bias_ref[0])
    o_ref[...] = (xf * scale).astype(o_ref.dtype)                 # multiply in f32, cast at store


# ---------------- Fallback stage 1: per-batch weighted mean -> sigmoid scale ----------------
def _reduce_kernel(bias_ref, w_ref, x_ref, scale_ref, *, tn, n_valid, w_resident):
    # grid = (batch_tiles, lane_tiles); lane axis is the reduction axis (last, "arbitrary")
    t = pl.program_id(1)

    @pl.when(t == 0)
    def _():
        scale_ref[...] = jnp.zeros_like(scale_ref)

    if w_resident:
        start = pl.multiple_of(t * tn, 128)
        w = w_ref[:, pl.ds(start, tn)]
    else:
        w = w_ref[...]

    # Mask the (possibly ragged) final lane tile explicitly — boundary-block reads are
    # unspecified and 0 * NaN would poison the reduction.
    col = t * tn + jax.lax.broadcasted_iota(jnp.int32, x_ref.shape, 1)
    xf = jnp.where(col < n_valid, x_ref[...].astype(jnp.float32), 0.0)
    scale_ref[...] += jnp.sum(xf * w, axis=-1, keepdims=True)

    @pl.when(t == pl.num_programs(1) - 1)
    def _():
        scale_ref[...] = jax.nn.sigmoid(scale_ref[...] + bias_ref[0])


# ---------------- Fallback stage 2: lane-dense broadcast multiply ----------------
def _apply_kernel(scale_ref, x_ref, o_ref):
    s = scale_ref[...]                                             # (Bt, 1) f32
    o_ref[...] = (x_ref[...].astype(jnp.float32) * s).astype(o_ref.dtype)


def spectral_attention(x, conv_w, conv_b):
    """x: (B, C, H, W). conv_w: (1, C, 1, 1). conv_b: (1,)."""
    B, C, H, W = x.shape
    HW = H * W
    N = C * HW
    dtype = x.dtype
    isize = jnp.dtype(dtype).itemsize
    sub = _sublane_multiple(dtype)

    x_flat = x.reshape(B, N)                                       # free row-major collapse
    bias = conv_b.reshape(1).astype(jnp.float32)
    # w_row[c*HW + hw] = conv_w[c] / HW  =>  sum(x_row * w_row) == conv1(avg_pool(x)) pre-bias.
    w_row = jnp.repeat(conv_w.reshape(C).astype(jnp.float32), HW) / jnp.float32(HW)

    # Modeled live VMEM of the fused kernel for a given batch tile:
    #   x in + out double-buffered + f32 intermediates (~2 copies) + w double-buffered.
    def fused_bytes(bt):
        return bt * N * (4 * isize + 8) + 2 * N * 4

    # ---------------------- fused single-pass path ----------------------
    if fused_bytes(min(B, sub)) <= _FUSE_BUDGET:
        if B <= sub:
            Bt = B                                                 # full (small) batch per step
        else:
            bt_cap = max(sub, _round_down(_FUSE_BUDGET // (N * (4 * isize + 8)), sub))
            # keep nb >= 2 so both v7x TensorCores get work, while staying VMEM-safe
            Bt = min(bt_cap, _round_up(pl.cdiv(B, 2), sub), _round_up(B, sub))
        nb = pl.cdiv(B, Bt)

        out_flat = pl.pallas_call(
            _fused_kernel,
            out_shape=jax.ShapeDtypeStruct((B, N), dtype),
            grid_spec=pltpu.PrefetchScalarGridSpec(
                num_scalar_prefetch=0,
                grid=(nb,),
                in_specs=[
                    pl.BlockSpec(memory_space=pltpu.SMEM),          # bias (1,)
                    pl.BlockSpec((1, N), lambda b: (0, 0)),         # w_rep (fetched once)
                    pl.BlockSpec((Bt, N), lambda b: (b, 0)),        # x row block
                ],
                out_specs=pl.BlockSpec((Bt, N), lambda b: (b, 0)),
            ),
            compiler_params=pltpu.CompilerParams(
                dimension_semantics=("parallel",),
                vmem_limit_bytes=_VMEM_LIMIT,
            ),
        )(bias, w_row.reshape(1, N), x_flat)
        return out_flat.reshape(B, C, H, W)

    # ---------------------- two-pass fallback (very large rows) ----------------------
    Bt = B if B <= sub else sub
    TN = max(128, _round_down(_TILE_TARGET // (Bt * isize), 128))   # ~2 MiB lane-dense x tiles
    TN = min(TN, _round_up(N, 128))
    nt = pl.cdiv(N, TN)
    nb = pl.cdiv(B, Bt)

    # w is tiny relative to x: zero-pad host-side so its boundary tile is well-defined.
    N_wpad = nt * TN
    w_pad = jnp.zeros((1, N_wpad), jnp.float32).at[0, :N].set(w_row)

    w_resident = (N_wpad * 4) <= (8 << 20)                          # keep whole w in VMEM if cheap
    if w_resident:
        w_spec = pl.BlockSpec((1, N_wpad), lambda b, t: (0, 0))     # constant index -> fetched once
    else:
        w_spec = pl.BlockSpec((1, TN), lambda b, t: (0, t))

    reduce_kernel = functools.partial(_reduce_kernel, tn=TN, n_valid=N, w_resident=w_resident)

    # Stage 1: per-batch scalar scale (f32 resident accumulator, reduction axis last).
    scale = pl.pallas_call(
        reduce_kernel,
        out_shape=jax.ShapeDtypeStruct((B, 1), jnp.float32),
        grid_spec=pltpu.PrefetchScalarGridSpec(
            num_scalar_prefetch=0,
            grid=(nb, nt),
            in_specs=[
                pl.BlockSpec(memory_space=pltpu.SMEM),              # bias (1,)
                w_spec,                                             # w_rep
                pl.BlockSpec((Bt, TN), lambda b, t: (b, t)),        # x tile
            ],
            out_specs=pl.BlockSpec((Bt, 1), lambda b, t: (b, 0)),   # resident accumulator
        ),
        compiler_params=pltpu.CompilerParams(
            dimension_semantics=("parallel", "arbitrary"),
            vmem_limit_bytes=_VMEM_LIMIT,
        ),
    )(bias, w_pad, x_flat)

    # Stage 2: broadcast multiply with large lane-dense tiles; boundary stores are masked.
    out_flat = pl.pallas_call(
        _apply_kernel,
        out_shape=jax.ShapeDtypeStruct((B, N), dtype),
        grid_spec=pltpu.PrefetchScalarGridSpec(
            num_scalar_prefetch=0,
            grid=(nb, nt),
            in_specs=[
                pl.BlockSpec((Bt, 1), lambda b, t: (b, 0)),         # per-batch scale
                pl.BlockSpec((Bt, TN), lambda b, t: (b, t)),        # x tile
            ],
            out_specs=pl.BlockSpec((Bt, TN), lambda b, t: (b, t)),
        ),
        compiler_params=pltpu.CompilerParams(
            dimension_semantics=("parallel", "parallel"),           # megacore-shardable
            vmem_limit_bytes=_VMEM_LIMIT,
        ),
    )(scale, x_flat)

    return out_flat.reshape(B, C, H, W)


def spectral_attention_ref(x, conv_w, conv_b):
    """Pure-JAX reference mirroring the PyTorch forward."""
    avg_pool = jnp.mean(x, axis=(2, 3), keepdims=True)                  # (B, C, 1, 1)
    logits = jnp.einsum("bcij,oc->boij", avg_pool, conv_w[:, :, 0, 0])  # (B, 1, 1, 1)
    logits = logits + conv_b.reshape(1, 1, 1, 1)
    channel_weights = jax.nn.sigmoid(logits)
    return x * channel_weights


if __name__ == "__main__":
    B, C, H, W = 2, 4, 16, 16

    key = jax.random.PRNGKey(0)
    kx, kw, kb = jax.random.split(key, 3)

    x = jax.random.normal(kx, (B, C, H, W), dtype=jnp.float32)
    # Shapes from nn.Conv2d(in_channels, 1, kernel_size=1).
    conv_w = jax.random.normal(kw, (1, C, 1, 1), dtype=jnp.float32) * 0.1
    conv_b = jax.random.normal(kb, (1,), dtype=jnp.float32) * 0.1

    out = spectral_attention(x, conv_w, conv_b)
    out = jax.block_until_ready(out)

    ref = spectral_attention_ref(x, conv_w, conv_b)
    assert out.shape == (B, C, H, W)
    assert jnp.allclose(out, ref, atol=1e-5, rtol=1e-5), "mismatch vs reference"

    print("KERNEL_OK")
</pallas_src>

<mosaic_0001>
module attributes {stable_mosaic.version = 11 : i64} {
  func.func @_fused_kernel(%arg0: i32, %arg1: memref<1xf32, #tpu.memory_space<smem>>, %arg2: memref<1x1024xf32, #tpu.memory_space<vmem>>, %arg3: memref<2x1024xf32, #tpu.memory_space<vmem>>, %arg4: memref<2x1024xf32, #tpu.memory_space<vmem>>) attributes {dimension_semantics = [#tpu.dimension_semantics<parallel>], iteration_bounds = array<i64: 1>, scalar_prefetch = 0 : i64, scratch_operands = 0 : i64, tpu.core_type = #tpu.core_type<tc>, window_params = [{transform_indices = @transform_0, window_bounds = array<i64: 1>}, {pipeline_mode = #tpu.pipeline_mode<synchronous>, transform_indices = @transform_1, window_bounds = array<i64: 1, 1024>}, {transform_indices = @transform_2, window_bounds = array<i64: 2, 1024>}, {transform_indices = @transform_3, window_bounds = array<i64: 2, 1024>}]} {
    %c0 = arith.constant 0 : index
    %c0_0 = arith.constant 0 : index
    %0 = vector.load %arg3[%c0, %c0_0] : memref<2x1024xf32, #tpu.memory_space<vmem>>, vector<2x1024xf32>
    %c0_1 = arith.constant 0 : index
    %c0_2 = arith.constant 0 : index
    %1 = vector.load %arg2[%c0_1, %c0_2] : memref<1x1024xf32, #tpu.memory_space<vmem>>, vector<1x1024xf32>
    %2 = vector.broadcast %1 : vector<1x1024xf32> to vector<2x1024xf32>
    %3 = arith.mulf %0, %2 : vector<2x1024xf32>
    %cst = arith.constant dense<0.000000e+00> : vector<2xf32>
    %4 = vector.multi_reduction <add>, %3, %cst [1] : vector<2x1024xf32> to vector<2xf32>
    %5 = vector.shape_cast %4 : vector<2xf32> to vector<2x1xf32>
    %c0_3 = arith.constant 0 : index
    %6 = memref.load %arg1[%c0_3] : memref<1xf32, #tpu.memory_space<smem>>
    %7 = vector.broadcast %6 : f32 to vector<2x1xf32>
    %8 = arith.addf %5, %7 : vector<2x1xf32>
    %9 = arith.negf %8 : vector<2x1xf32>
    %10 = math.exp %9 : vector<2x1xf32>
    %cst_4 = arith.constant 1.000000e+00 : f32
    %11 = vector.broadcast %cst_4 : f32 to vector<2x1xf32>
    %12 = arith.addf %11, %10 : vector<2x1xf32>
    %13 = arith.divf %11, %12 : vector<2x1xf32>
    %14 = vector.broadcast %13 : vector<2x1xf32> to vector<2x1024xf32>
    %15 = arith.mulf %0, %14 : vector<2x1024xf32>
    %c0_5 = arith.constant 0 : index
    %c0_6 = arith.constant 0 : index
    %16 = vector.load %arg4[%c0_5, %c0_6] : memref<2x1024xf32, #tpu.memory_space<vmem>>, vector<2x1024xf32>
    tpu.vector_store %arg4[%c0_5, %c0_6], %15 {strides = array<i32>} : memref<2x1024xf32, #tpu.memory_space<vmem>>, vector<2x1024xf32>,
    return
  }
  func.func @transform_0(%arg0: i32) -> i32 {
    %c0_i32 = arith.constant 0 : i32
    %c0_i32_0 = arith.constant 0 : i32
    return %c0_i32 : i32
  }
  func.func @transform_1(%arg0: i32) -> (i32, i32) {
    %c0_i32 = arith.constant 0 : i32
    %c0_i32_0 = arith.constant 0 : i32
    %c0_i32_1 = arith.constant 0 : i32
    return %c0_i32, %c0_i32_0 : i32, i32
  }
  func.func @transform_2(%arg0: i32) -> (i32, i32) {
    %c0_i32 = arith.constant 0 : i32
    %c0_i32_0 = arith.constant 0 : i32
    return %arg0, %c0_i32 : i32, i32
  }
  func.func @transform_3(%arg0: i32) -> (i32, i32) {
    %c0_i32 = arith.constant 0 : i32
    %c0_i32_0 = arith.constant 0 : i32
    return %arg0, %c0_i32 : i32, i32
  }
}

</mosaic_0001>

<bundles_post_ra>
// kernel: tpu_custom_call.1
= control target key start
LH: loop header
LB: loop body
LE: loop exit
PB: predicated region body
PF: predicated region fallthrough
CT: control target
= control target key end

     0   :  { %9 = vsyncpa [#allocation4], 0  ;;  %s347_s0 = inlined_call_operand.<no memory space> [shape: f32[1], index: 0, kind: input, shape index: {}]   ;;  %s348_s1 = inlined_call_operand.hbm [shape: f32[1,1024], index: 1, kind: input, shape index: {}]   ;;  %s349_s2 = inlined_call_operand.hbm [shape: f32[2,1024], index: 2, kind: input, shape index: {}]   ;;  %s350_s3 = inlined_call_operand.hbm [shape: f32[2,1024], index: 3, kind: output, shape index: {}]  }
   0x1   :  { %10 = vsyncpa [#allocation7], 0 }
   0x2   :  { %11 = vsyncpa [#allocation5], 0  ;;  %s290_s12 = smov [#allocation3]   ;;  %s291_s14 = smov [#allocation6]  }
   0x3   :  { %s20_s13 = sshll.u32 %s290_s12, 4  ;;  %s30_s15 = sshll.u32 %s291_s14, 4  ;;  %s21_s13 = int_to_ptr.vmem [resolvable:$true] %s20_s13  ;;  %s31_s15 = int_to_ptr.vmem [resolvable:$true] %s30_s15 }
   0x4   :  { %s232_s16 = scalar_lea.vmem %s21_s13, 128  ;;  %p237_p1 = scmp.lt.s32.totalorder %s21_s13, %s21_s13 }
   0x5   :  { %p233_p0 = scmp.ne.s32.totalorder %s21_s13, %s232_s16  ;;  %p238_p2 = scmp.lt.s32.totalorder %s232_s16, %s232_s16 }
   0x7   :  { %p239_p3 = por %p238_p2, %p237_p1 }
   0x9   :  { %p240_p4 = pnand %p239_p3, %p233_p0 }
   0xb   :  { %243 = shalt.err (!%p240_p4)
}
   0xc   :  { %23 = dma.hbm_to_vmem [thread:$0]  %s348_s1, 128, %s21_s13, [#allocation4]  }
   0xd   :  { %s252_s19 = scalar_lea.vmem %s31_s15, 256  ;;  %p257_p6 = scmp.lt.s32.totalorder %s31_s15, %s31_s15 }
   0xe   :  { %p253_p5 = scmp.ne.s32.totalorder %s31_s15, %s252_s19  ;;  %p258_p7 = scmp.lt.s32.totalorder %s252_s19, %s252_s19 }
  0x10   :  { %p259_p8 = por %p258_p7, %p257_p6 }
  0x12   :  { %p260_p9 = pnand %p259_p8, %p253_p5 }
  0x14   :  { %263 = shalt.err (!%p260_p9)
}
  0x15   :  { %33 = dma.hbm_to_vmem [thread:$0]  %s349_s2, 256, %s31_s15, [#allocation7]  }
  0x16   :  { %284 = dma.done.wait [#allocation4], 128  }
  0x17   :  { %285 = vsyncadd [#allocation4], 4294967168 }
  0x18   :  { %286 = dma.done.wait [#allocation7], 256  }
  0x19   :  { %287 = vsyncadd [#allocation7], 4294967040  ;;  %v44_v0 = vlaneseq  ;;  %v292_v1 = vmov 1983009808   ;;  %v42_v13 = vld [vmem:[#allocation3] sm:$0xff]  ;;  %v40_v29 = vld [vmem:[#allocation6] sm:$0xff]  ;;  %v177_v62 = vstv %s347_s0 }
  0x1a   :  { %v79_v2 = vunpack.c.l.s4 %v292_v1  ;;  %v41_v32 = vld [vmem:[#allocation6 + $0x8] sm:$0xff]  ;;  %vm158_vm0 = vcmask 1041408   ;;  %s294_s22 = smov [#allocation8]  }
  0x1b   :  { %v321_v3 = vshrl.u32 %v44_v0, 7  ;;  %s204_s23 = sshll.u32 %s294_s22, 4  ;;  %s205_s23 = int_to_ptr.vmem [resolvable:$true] %s204_s23 }
  0x1c   :  { %v80_v4 = vunpack.c.0.s8 %v79_v2  ;;  %s264_s0 = scalar_lea.vmem %s205_s23, 256  ;;  %p269_p11 = scmp.lt.s32.totalorder %s205_s23, %s205_s23 }
  0x1d   :  { %v46_v5 = vsub.s32 0, %v321_v3  ;;  %v50_v6 = vsub.s32 1, %v321_v3  ;;  %v54_v7 = vsub.s32 2, %v321_v3  ;;  %v58_v8 = vsub.s32 3, %v321_v3  ;;  %p265_p10 = scmp.ne.s32.totalorder %s205_s23, %s264_s0  ;;  %p270_p12 = scmp.lt.s32.totalorder %s264_s0, %s264_s0 }
  0x1e   :  { %v62_v9 = vsub.s32 4, %v321_v3  ;;  %v66_v10 = vsub.s32 5, %v321_v3  ;;  %v70_v11 = vsub.s32 6, %v321_v3  ;;  %v74_v12 = vsub.s32 7, %v321_v3 }
  0x1f   :  { %v83_v14 = vsub.s32 %v80_v4, %v321_v3  ;;  %v47_v15 = vrot.slane %v42_v13, %v46_v5  ;;  %v51_v16 = vrot.slane %v42_v13, %v50_v6  ;;  %v55_v17 = vrot.slane %v42_v13, %v54_v7  ;;  %p271_p13 = por %p270_p12, %p269_p11 }
  0x20   :  { %v59_v18 = vrot.slane %v42_v13, %v58_v8  ;;  %v63_v19 = vrot.slane %v42_v13, %v62_v9  ;;  %v67_v20 = vrot.slane %v42_v13, %v66_v10  ;;  %v71_v21 = vrot.slane %v42_v13, %v70_v11 }
  0x21   :  { %v75_v22 = vrot.slane %v42_v13, %v74_v12  ;;  %v76_v23 = vcombine.low %v47_v15, %v51_v16  ;;  %v293_v5 = vmov 269488144   ;;  %p272_p0 = pnand %p271_p13, %p265_p10 }
  0x22   :  { %v77_v24 = vcombine.low %v55_v17, %v59_v18  ;;  %v93_v25 = vcombine.low %v63_v19, %v67_v20  ;;  %v187_v6 = vunpack.c.l.s4 %v293_v5 }
  0x23   :  { %v94_v26 = vcombine.low %v71_v21, %v75_v22  ;;  %v84_v27 = vrot.slane %v76_v23, %v83_v14 }
  0x24   :  { %v91_v28 = vrot.slane %v77_v24, %v83_v14  ;;  %v101_v30 = vrot.slane %v93_v25, %v83_v14  ;;  %v188_v7 = vunpack.c.0.s8 %v187_v6 }
  0x25   :  { %v108_v31 = vrot.slane %v94_v26, %v83_v14 }
  0x26   :  { %v92_v33 = vcombine.low %v84_v27, %v91_v28  ;;  %v191_v8 = vsub.s32 %v188_v7, %v321_v3 }
  0x27   :  { %v109_v34 = vcombine.low %v101_v30, %v108_v31 }
  0x28   :  { %v112_v35 = vmul.f32 %v92_v33, %v40_v29 }
  0x29   :  { %v113_v36 = vmul.f32 %v109_v34, %v41_v32 }
  0x2a   :  { %v116_v37 = vcombine.high %v112_v35, %v112_v35  ;;  %v123_v38 = vrot.slane %v112_v35, %v83_v14 }
  0x2b   :  { %v133_v39 = vcombine.high %v113_v36, %v113_v36  ;;  %v140_v42 = vrot.slane %v113_v36, %v83_v14 }
  0x2c   :  { %v130_v40 = vrot.slane %v116_v37, %v83_v14  ;;  %v131_v41 = vcombine.high %v123_v38, %v123_v38  ;;  %v159_v43 = vsel %vm158_vm0, %v123_v38, 0.0 }
  0x2d   :  { %v147_v48 = vrot.slane %v133_v39, %v83_v14  ;;  %v148_v49 = vcombine.high %v140_v42, %v140_v42  ;;  %v166_v52 = vsel %vm158_vm0, %v140_v42, 0.0 }
  0x2e   :  { %v132_v44 = vcombine.high %v130_v40, %v130_v40  ;;  %v160_v45 = vsel %vm158_vm0, %v131_v41, 0.0  ;;  %v162_v46 = vsel %vm158_vm0, %v130_v40, 0.0 }
  0x2f   :  { %v161_v47 = vadd.f32 %v160_v45, %v159_v43  ;;  %v149_v54 = vcombine.high %v147_v48, %v147_v48  ;;  %v168_v55 = vsel %vm158_vm0, %v148_v49, 0.0  ;;  %v170_v57 = vsel %vm158_vm0, %v147_v48, 0.0 }
  0x30   :  { %v164_v50 = vsel %vm158_vm0, %v132_v44, 0.0 }
  0x31   :  { %v163_v51 = vadd.f32 %v162_v46, %v161_v47  ;;  %v172_v59 = vsel %vm158_vm0, %v149_v54, 0.0 }
  0x33   :  { %v165_v53 = vadd.f32 %v164_v50, %v163_v51 }
  0x35   :  { %v167_v56 = vadd.f32 %v166_v52, %v165_v53 }
  0x37   :  { %v169_v58 = vadd.f32 %v168_v55, %v167_v56 }
  0x39   :  { %v171_v60 = vadd.f32 %v170_v57, %v169_v58 }
  0x3b   :  { %v173_v61 = vadd.f32 %v172_v59, %v171_v60 }
  0x3d   :  { %174 = vadd.xlane.f32.xlu0 %v173_v61 }
  0xc6   :  { %v175_v63 = vpop.xlane.xlu0 %174 }
  0xc7   :  { %v178_v0 = vadd.f32 %v177_v62, %v175_v63 }
  0xc9   :  { %v214_v1 = vmul.f32 -1.442695, %v178_v0 }
  0xcb   :  { %220 = vpow2.f32 %v214_v1 }
  0xd8   :  { %v221_v2 = vpop.eup %220 }
  0xd9   :  { %v182_v4 = vadd.f32 1.0, %v221_v2 }
  0xdb   :  { %222 = vrcp.f32 %v182_v4 }
  0xe8   :  { %v223_v9 = vpop.eup %222 }
  0xe9   :  { %v192_v10 = vrot.slane %v223_v9, %v191_v8 }
  0xeb   :  { %v194_v11 = vmul.f32 %v192_v10, %v40_v29  ;;  %v195_v12 = vmul.f32 %v192_v10, %v41_v32 }
  0xed   :  { %196 = vst [vmem:[#allocation8] sm:$0xff] %v194_v11  ;;  %197 = vst [vmem:[#allocation8 + $0x8] sm:$0xff] %v195_v12 }
  0xee   :  { %275 = shalt.err (!%p272_p0)
}
  0xef   :  { %207 = dma.vmem_to_hbm [thread:$0]  %s205_s23, 256, %s350_s3, [#allocation5]  }
  0xf0   :  { %288 = dma.done.wait [#allocation5], 256  }
  0xf1   :  { %289 = vsyncadd [#allocation5], 4294967040 }
  0xf2   :  { %211 = vsyncpa [#allocation4], 1 }
  0xf3   :  { %212 = vsyncpa [#allocation7], 1 }
  0xf4   :  { %213 = vsyncpa [#allocation5], 1 }

</bundles_post_ra>
